<compile_context>
chip_gen: v7x
topology: tpu7x:2x2x1
jax: 0.10.0
libtpu: 0.0.40
codegen_flags: <defaults>
</compile_context>

<pallas_src>
import functools
import math

import jax
import jax.numpy as jnp
from jax.experimental import pallas as pl
from jax.experimental.pallas import tpu as pltpu


LANE = 128              # lane-dense last block dim (multiple of 128 -> unmasked stores)
MAX_BLOCK_ROWS = 8192   # 8192*128*4B = 4 MiB/block (f32); 2x in + 2x out + scratch ~= 20 MiB


def _round_up(a: int, b: int) -> int:
    return ((a + b - 1) // b) * b


def _sublane(dtype) -> int:
    # Native packed sublane count: 8 for 32-bit, 16 for 16-bit, 32 for 8-bit dtypes.
    return max(8, 32 // jnp.dtype(dtype).itemsize)


def _lif_kernel(x_ref, o_ref, mem_ref, *, tau: float, thresh: float):
    # Grid = (row_tiles, T); T is the last (sequential) grid axis, so mem_ref
    # (VMEM f32 scratch) carries the membrane potential across timesteps for
    # the current row tile. Re-initialize it when a new tile starts (t == 0).
    t = pl.program_id(1)

    @pl.when(t == 0)
    def _():
        mem_ref[...] = jnp.zeros_like(mem_ref)

    x = x_ref[...].astype(jnp.float32)
    if tau == 1.0:                       # tau is a Python float at trace time
        mem = mem_ref[...] + x
    else:
        mem = mem_ref[...] * tau + x
    spike = mem >= thresh                          # ZIF.forward (Heaviside)
    mem_ref[...] = jnp.where(spike, 0.0, mem)      # hard reset where spiked
    o_ref[...] = spike.astype(o_ref.dtype)


def lif_spike(x: jax.Array, T: int, thresh: float = 1.0, tau: float = 1.0,
              gama: float = 1.0) -> jax.Array:
    """Forward of LIFSpike: input (T*B, C, H, W) -> spikes (T*B, C, H, W)."""
    del gama  # only used by the surrogate-gradient backward, not the forward
    if T <= 0:
        return jnp.maximum(x, 0.0)  # nn.ReLU branch

    TB = x.shape[0]
    assert TB % T == 0, "leading dim must be T * batch"
    feat_shape = x.shape[1:]
    N = (TB // T) * math.prod(feat_shape)     # elements per timestep (B*C*H*W)

    # Expand temporal dim + flatten features (metadata-only reshape).
    x2 = x.reshape(T, N)

    # Only pad the feature axis up to a multiple of 128 when strictly needed for
    # the lane-dense reshape; the row axis is NOT padded (ragged edge blocks are
    # masked by Pallas).
    N_pad = _round_up(N, LANE)
    if N_pad != N:
        x2 = jnp.pad(x2, ((0, 0), (0, N_pad - N)))
    M = N_pad // LANE
    x3 = x2.reshape(T, M, LANE)

    # Block sizing: aim for >= 2 row tiles (lets v7x shard the parallel axis
    # across its 2 TensorCores; harmless on 1-TC v5e/v6e), capped at 4 MiB/buffer.
    sublane = _sublane(x.dtype)
    block_rows = min(_round_up(pl.cdiv(M, 2), sublane), MAX_BLOCK_ROWS)
    block_rows = max(block_rows, sublane)

    grid = (pl.cdiv(M, block_rows), T)        # row tiles parallel, T sequential
    block_spec = pl.BlockSpec(
        (pl.Squeezed(), block_rows, LANE),
        lambda j, t: (t, j, 0),
    )

    itemsize = jnp.dtype(x.dtype).itemsize
    out3 = pl.pallas_call(
        functools.partial(_lif_kernel, tau=float(tau), thresh=float(thresh)),
        out_shape=jax.ShapeDtypeStruct((T, M, LANE), x.dtype),
        grid=grid,
        in_specs=[block_spec],
        out_specs=block_spec,
        scratch_shapes=[pltpu.VMEM((block_rows, LANE), jnp.float32)],
        compiler_params=pltpu.CompilerParams(
            dimension_semantics=("parallel", "arbitrary"),
        ),
        cost_estimate=pl.CostEstimate(
            flops=4 * T * N_pad,
            transcendentals=0,
            bytes_accessed=2 * T * N_pad * itemsize,
        ),
    )(x3)

    out = out3.reshape(T, N_pad)
    if N_pad != N:
        out = out[:, :N]
    return out.reshape(TB, *feat_shape)       # MergeTemporalDim (metadata only)


def lif_reference(x: jax.Array, T: int, thresh: float = 1.0, tau: float = 1.0) -> jax.Array:
    """Pure-JAX reference mirroring the PyTorch forward (bptt branch)."""
    TB = x.shape[0]
    xs = x.reshape(T, TB // T, *x.shape[1:])
    mem = jnp.zeros(xs.shape[1:], dtype=jnp.float32)
    spikes = []
    for t in range(T):
        mem = mem * tau + xs[t].astype(jnp.float32)
        spike = ((mem - thresh) >= 0.0).astype(jnp.float32)
        mem = (1.0 - spike) * mem
        spikes.append(spike.astype(x.dtype))
    return jnp.stack(spikes, 0).reshape(x.shape)


if __name__ == "__main__":
    key = jax.random.PRNGKey(0)

    # Case 1: lane-aligned shape (typical CNN feature map), 2 row tiles.
    T, B, C, H, W = 4, 2, 4, 16, 16
    x = jax.random.normal(key, (T * B, C, H, W), dtype=jnp.float32)
    out = jax.block_until_ready(lif_spike(x, T, thresh=1.0, tau=1.0))
    ref = lif_reference(x, T, thresh=1.0, tau=1.0)
    assert out.shape == x.shape and out.dtype == x.dtype
    assert jnp.array_equal(out, ref), "mismatch vs reference LIF forward (aligned case)"
    assert jnp.all((out == 0.0) | (out == 1.0))

    # Case 2: non-128-multiple feature size + ragged last row tile (masked edge block).
    T2, B2, C2, H2, W2 = 2, 2, 3, 15, 15
    x2 = jax.random.normal(jax.random.PRNGKey(1), (T2 * B2, C2, H2, W2), dtype=jnp.float32)
    out2 = jax.block_until_ready(lif_spike(x2, T2, thresh=1.0, tau=0.5))
    ref2 = lif_reference(x2, T2, thresh=1.0, tau=0.5)
    assert out2.shape == x2.shape and out2.dtype == x2.dtype
    assert jnp.array_equal(out2, ref2), "mismatch vs reference LIF forward (ragged case)"

    print("KERNEL_OK")
</pallas_src>

<mosaic_0001>
module attributes {stable_mosaic.version = 11 : i64} {
  func.func @_lif_kernel(%arg0: i32, %arg1: i32, %arg2: memref<1x8x128xf32, #tpu.memory_space<vmem>>, %arg3: memref<1x8x128xf32, #tpu.memory_space<vmem>>, %arg4: memref<8x128xf32, #tpu.memory_space<vmem>>) attributes {dimension_semantics = [#tpu.dimension_semantics<parallel>, #tpu.dimension_semantics<arbitrary>], iteration_bounds = array<i64: 2, 4>, scalar_prefetch = 0 : i64, scratch_operands = 1 : i64, tpu.core_type = #tpu.core_type<tc>, window_params = [{transform_indices = @transform_0, window_bounds = array<i64: 1, 8, 128>}, {transform_indices = @transform_1, window_bounds = array<i64: 1, 8, 128>}]} {
    %c0_i32 = arith.constant 0 : i32
    %0 = arith.cmpi eq, %arg1, %c0_i32 : i32
    %1 = arith.extui %0 : i1 to i32
    %c0_i32_0 = arith.constant 0 : i32
    %2 = arith.cmpi ne, %1, %c0_i32_0 : i32
    scf.if %2 {
      %cst_11 = arith.constant 0.000000e+00 : f32
      %17 = vector.broadcast %cst_11 : f32 to vector<8x128xf32>
      %c0_12 = arith.constant 0 : index
      %c0_13 = arith.constant 0 : index
      %18 = vector.load %arg4[%c0_12, %c0_13] : memref<8x128xf32, #tpu.memory_space<vmem>>, vector<8x128xf32>
      tpu.vector_store %arg4[%c0_12, %c0_13], %17 {strides = array<i32>} : memref<8x128xf32, #tpu.memory_space<vmem>>, vector<8x128xf32>,
    } else {
    }
    %c0 = arith.constant 0 : index
    %c0_1 = arith.constant 0 : index
    %c0_2 = arith.constant 0 : index
    %3 = vector.load %arg2[%c0, %c0_1, %c0_2] : memref<1x8x128xf32, #tpu.memory_space<vmem>>, vector<1x8x128xf32>
    %4 = vector.shape_cast %3 : vector<1x8x128xf32> to vector<8x128xf32>
    %c0_3 = arith.constant 0 : index
    %c0_4 = arith.constant 0 : index
    %5 = vector.load %arg4[%c0_3, %c0_4] : memref<8x128xf32, #tpu.memory_space<vmem>>, vector<8x128xf32>
    %6 = arith.addf %5, %4 : vector<8x128xf32>
    %cst = arith.constant 1.000000e+00 : f32
    %7 = vector.broadcast %cst : f32 to vector<8x128xf32>
    %8 = arith.cmpf oge, %6, %7 : vector<8x128xf32>
    %cst_5 = arith.constant 0.000000e+00 : f32
    %9 = vector.broadcast %cst_5 : f32 to vector<8x128xf32>
    %10 = arith.select %8, %9, %6 : vector<8x128xi1>, vector<8x128xf32>
    %c0_6 = arith.constant 0 : index
    %c0_7 = arith.constant 0 : index
    %11 = vector.load %arg4[%c0_6, %c0_7] : memref<8x128xf32, #tpu.memory_space<vmem>>, vector<8x128xf32>
    tpu.vector_store %arg4[%c0_6, %c0_7], %10 {strides = array<i32>} : memref<8x128xf32, #tpu.memory_space<vmem>>, vector<8x128xf32>,
    %12 = arith.extui %8 : vector<8x128xi1> to vector<8x128xi32>
    %13 = arith.sitofp %12 : vector<8x128xi32> to vector<8x128xf32>
    %c0_8 = arith.constant 0 : index
    %c0_9 = arith.constant 0 : index
    %c0_10 = arith.constant 0 : index
    %14 = vector.load %arg3[%c0_8, %c0_9, %c0_10] : memref<1x8x128xf32, #tpu.memory_space<vmem>>, vector<1x8x128xf32>
    %15 = vector.shape_cast %14 : vector<1x8x128xf32> to vector<8x128xf32>
    %16 = vector.shape_cast %13 : vector<8x128xf32> to vector<1x8x128xf32>
    tpu.vector_store %arg3[%c0_8, %c0_9, %c0_10], %16 {strides = array<i32>} : memref<1x8x128xf32, #tpu.memory_space<vmem>>, vector<1x8x128xf32>,
    return
  }
  func.func @transform_0(%arg0: i32, %arg1: i32) -> (i32, i32, i32) {
    %c0_i32 = arith.constant 0 : i32
    %c0_i32_0 = arith.constant 0 : i32
    return %arg1, %arg0, %c0_i32 : i32, i32, i32
  }
  func.func @transform_1(%arg0: i32, %arg1: i32) -> (i32, i32, i32) {
    %c0_i32 = arith.constant 0 : i32
    %c0_i32_0 = arith.constant 0 : i32
    return %arg1, %arg0, %c0_i32 : i32, i32, i32
  }
}

</mosaic_0001>

<bundles_post_ra>
// kernel: tpu_custom_call.1
= control target key start
LH: loop header
LB: loop body
LE: loop exit
PB: predicated region body
PF: predicated region fallthrough
CT: control target
= control target key end

     0   :  { %6 = vsyncpa [#allocation4], 0  ;;  %s701_s0 = inlined_call_operand.hbm [shape: f32[4,16,128], index: 0, kind: input, shape index: {}]   ;;  %s702_s1 = inlined_call_operand.hbm [shape: f32[4,16,128], index: 1, kind: output, shape index: {}]  }
   0x1   :  { %8 = vsyncpa [#allocation4 + $0x1], 0 }
   0x2   :  { %9 = vsyncpa [#allocation5], 0 }
   0x3   :  { %11 = vsyncpa [#allocation5 + $0x1], 0  ;;  %s506_s6 = smov 0   ;;  %s508_s7 = smov 0  }
   0x4   :  { %s510_s8 = smov 0   ;;  %s512_s9 = smov 0  }
   0x5   :  { %s514_s10 = smov 0   ;;  %s516_s11 = smov 0  }
   0x6   :  { %s518_s12 = smov 0   ;;  %s520_s13 = smov 0  }
   0x7 LB: > { %s265_s14 = sadd.s32 4294967295, %s490_s13   ;;  %s266_s15 = sadd.s32 4294967294, %s490_s13   ;;  %s490_s13 = sphi %s520_s13, %s17_s13   ;;  %s486_s12 = sphi %s518_s12, %s719_s12   ;;  %s482_s11 = sphi %s516_s11, %s718_s11   ;;  %s478_s10 = sphi %s514_s10, %s717_s10   ;;  %s474_s9 = sphi %s512_s9, %s716_s9   ;;  %s470_s8 = sphi %s510_s8, %s715_s8   ;;  %s466_s7 = sphi %s508_s7, %s714_s7   ;;  %s462_s6 = sphi %s506_s6, %s713_s6  }
   0x8   : > { %s26_s16 = sadd.s32 1, %s482_s11  ;;  %s29_s17 = sadd.s32 1, %s486_s12 }
   0x9   : > { %p27_p0 = scmp.ge.s32.totalorder %s26_s16, 4  ;;  %s38_s18 = sadd.s32 1, %s470_s8 }
   0xa   : > { %p45_p1 = scmp.ne.s32.totalorder %s470_s8, %s466_s7  ;;  %p46_p2 = scmp.eq.s32.totalorder %s490_s13, 0 }
   0xb   : > { %s721_s16 = smov (%p27_p0, %s26_s16), 0  ;;  %s723_s17 = smov (!%p27_p0, %s29_s17), %s486_s12 }
   0xc   : > { %s33_s19 = ssub.s32 %s482_s11, %s721_s16  ;;  %p559_p3 = por %p46_p2, %p45_p1 }
   0xd   : > { %p31_p4 = scmp.ge.s32.totalorder %s723_s17, 2  ;;  %p51_p5 = scmp.ne.s32.totalorder %s466_s7, %s462_s6 }
   0xe   : > { %p52_p6 = scmp.eq.s32.totalorder %s265_s14, 0  ;;  %p77_p7 = scmp.eq.s32.totalorder %s265_s14, 7 }
   0xf   : > { %s725_s17 = smov (%p31_p4, %s723_s17), 0  ;;  %p83_p10 = scmp.eq.s32.totalorder %s266_s15, 7 }
  0x10   : > { %p567_p8 = por %p52_p6, %p51_p5  ;;  %p571_p9 = por %p77_p7, %p45_p1 }
  0x11   : > { %s34_s23 = ssub.s32 %s486_s12, %s725_s17  ;;  %p577_p12 = por %p83_p10, %p51_p5 }
  0x12   : > { %s706_s22 = scalar_select %p571_p9, 1, 0 }
  0x13   : > { %s35_s24 = sor.u32 %s34_s23, %s33_s19  ;;  %p294_p13 = scmp.lt.s32.totalorder %s490_s13, 8 }
  0x14   : > { %p36_p11 = scmp.eq.s32.totalorder %s35_s24, 0  ;;  %s103_s26 = sand.u32 1, %s470_s8  }
  0x15   : > { %s707_s25 = scalar_select %p577_p12, 1, 0 }
  0x16   : > { %s584_s27 = scalar_select %p36_p11, %s470_s8, %s38_s18  }
  0x17   : > { %s269_s28 = sshll.u32 %s103_s26, 3  ;;  %s270_s29 = sshll.u32 %s482_s11, 1 }
  0x18   : > { %s112_s30 = sadd.s32 %s486_s12, %s270_s29  ;;  %s107_s2 = scalar_lea.vmem [#allocation3], %s269_s28 }
  0x19   : > { %s116_s3 = sshll.u32 %s107_s2, 4  ;;  %s271_s4 = sshll.u32 %s112_s30, 7  ;;  %s588_s3 = int_to_ptr.vmem [resolvable:$true] %s116_s3 }
  0x1a   : > { %s593_s15 = scalar_lea.hbm %s701_s0, %s271_s4  ;;  %p597_p0 = pnand %p294_p13, %p559_p3 }
  0x1b   : > { %s104_s19 = scalar_lea.sflag [#allocation4], %s103_s26  ;;  %s362_s23 = scalar_lea.hbm %s593_s15, 128 }
  0x1c   : > { %p363_p4 = scmp.ne.s32.totalorder %s593_s15, %s362_s23  ;;  %p364_p5 = pneg %p597_p0 }
  0x1d   : > { %s367_s28 = scalar_lea.hbm %s701_s0, 1024  ;;  %p368_p3 = scmp.lt.u32.totalorder %s593_s15, %s701_s0 }
  0x1e   : > { %p365_p6 = pnand %p364_p5, %p363_p4  ;;  %p369_p10 = scmp.lt.u32.totalorder %s367_s28, %s362_s23 }
  0x1f   : > { %p371_p13 = scmp.lt.u32.totalorder %s362_s23, %s593_s15 }
  0x20   : > { %p366_p7 = pneg %p365_p6  ;;  %p370_p11 = por %p369_p10, %p368_p3 }
  0x22   : > { %p372_p1 = por %p371_p13, %p370_p11 }
  0x24   : > { %p373_p2 = pnand %p372_p1, %p366_p7 }
  0x26   : > { %376 = shalt.err (!%p373_p2)
}
  0x27   : > { %s377_s26 = scalar_lea.vmem %s588_s3, 128  ;;  %s492_s2 = smov [#allocation3]  }
  0x28   : > { %p378_p4 = scmp.ne.s32.totalorder %s588_s3, %s377_s26  ;;  %s382_s4 = sshll.u32 %s492_s2, 4  ;;  %s383_s4 = int_to_ptr.vmem [resolvable:$false] %s382_s4 }
  0x29   : > { %s384_s5 = scalar_lea.vmem %s383_s4, 256  ;;  %p385_p9 = scmp.lt.s32.totalorder %s588_s3, %s383_s4 }
  0x2a   : > { %p380_p6 = pnand %p378_p4, %p364_p5  ;;  %p386_p3 = scmp.lt.s32.totalorder %s384_s5, %s377_s26 }
  0x2c   : > { %p381_p12 = pneg %p380_p6  ;;  %p387_p10 = por %p386_p3, %p385_p9 }
  0x2e   : > { %p388_p11 = pnand %p387_p10, %p381_p12 }
  0x30   : > { %391 = shalt.err (!%p388_p11)
}
  0x31   : > { %289 = dma.hbm_to_vmem [thread:$0]  (!%p597_p0), %s593_s15, 128, %s588_s3, %s104_s19  }
  0x32   : > { %p709_p1 = scmp.lt.s32.totalorder %s490_s13, 9  ;;  %p710_p2 = scmp.ge.s32.totalorder %s490_s13, 1 }
  0x34   : > { %p122_p5 = pnand %p710_p2, %p709_p1 }
  0x35   : > { %s633_s14 = sand.u32 (!%p122_p5), 1, %s466_s7  }
  0x36   : > { %125 = sbr.rel (%p122_p5) target bundleno = 97 (0x61), region = 24  ;;  %s273_s23 = sshll.u32 (!%p122_p5), %s633_s14, 3 }
  0x37   : > { %s128_s20 = scalar_lea.sflag (!%p122_p5), [#allocation4], %s633_s14  ;;  %s131_s24 = scalar_lea.vmem (!%p122_p5), [#allocation3], %s273_s23 }
  0x3d   : > { %453 = dma.done.wait (%p567_p8), %s128_s20, 128  }
  0x3e   : > { %455 = vsyncadd (%p567_p8), %s128_s20, 4294967168  ;;  %s149_s18 = scalar_lea.vmem [#allocation6], %s273_s23  ;;  %p275_p9 = scmp.ne.s32.totalorder %s474_s9, 0 }
  0x3f   : > { %v493_v0 = vmov (!%p275_p9), 0.0  }
  0x40   : > { %153 = sbr.rel (%p275_p9) target bundleno = 71 (0x47), region = 32  ;;  %154 = vst [vmem:[#allocation2] sm:$0xff] (!%p275_p9), %v493_v0 }
  0x47 PF: > { %v155_v1 = vld [vmem:[%s131_s24] sm:$0xff]  ;;  %v156_v2 = vld [vmem:[#allocation2] sm:$0xff]  ;;  %s278_s3 = sshll.u32 %s474_s9, 1  ;;  %s180_s19 = sshll.u32 %s149_s18, 4  ;;  %v494_v4 = vmov 0.0   ;;  %s649_s19 = int_to_ptr.vmem [resolvable:$true] %s180_s19 }
  0x48   : > { %v157_v3 = vadd.f32 %v156_v2, %v155_v1  ;;  %s176_s15 = sadd.s32 %s478_s10, %s278_s3  ;;  %s165_s9 = scalar_lea.sflag [#allocation5], %s633_s14 }
  0x49   : > { %s279_s28 = sshll.u32 %s176_s15, 7  ;;  %s392_s10 = scalar_lea.vmem %s649_s19, 128 }
  0x4a   : > { %vm158_vm0 = vcmp.ge.f32.partialorder %v157_v3, 1.0  ;;  %s647_s30 = scalar_lea.hbm %s702_s1, %s279_s28  ;;  %p393_p8 = scmp.ne.s32.totalorder %s649_s19, %s392_s10 }
  0x4b   : > { %v276_v5 = vsel %vm158_vm0, 1.0, %v494_v4  ;;  %v159_v6 = vsel %vm158_vm0, 0.0, %v157_v3  ;;  %p711_p12 = scmp.ne.s32.totalorder %s706_s22, 0  ;;  %s495_s26 = smov [#allocation6]  }
  0x4c   : > { %163 = vst [vmem:[%s149_s18] sm:$0xff] %v276_v5  ;;  %160 = vst [vmem:[#allocation2] sm:$0xff] %v159_v6  ;;  %s396_s2 = sshll.u32 %s495_s26, 4  ;;  %s397_s2 = int_to_ptr.vmem [resolvable:$false] %s396_s2 }
  0x4d   : > { %p394_p0 = pnand %p393_p8, %p711_p12  ;;  %s398_s4 = scalar_lea.vmem %s397_s2, 256 }
  0x4e   : > { %p399_p13 = scmp.lt.s32.totalorder %s649_s19, %s397_s2  ;;  %p400_p4 = scmp.lt.s32.totalorder %s398_s4, %s392_s10 }
  0x4f   : > { %p395_p7 = pneg %p394_p0 }
  0x50   : > { %p401_p6 = por %p400_p4, %p399_p13 }
  0x52   : > { %p402_p3 = pnand %p401_p6, %p395_p7 }
  0x54   : > { %405 = shalt.err (!%p402_p3)
}
  0x55   : > { %s406_s5 = scalar_lea.hbm %s647_s30, 128  ;;  %s410_s20 = scalar_lea.hbm %s702_s1, 1024 }
  0x56   : > { %p407_p10 = scmp.ne.s32.totalorder %s647_s30, %s406_s5  ;;  %p411_p2 = scmp.lt.u32.totalorder %s647_s30, %s702_s1 }
  0x57   : > { %p412_p5 = scmp.lt.u32.totalorder %s410_s20, %s406_s5  ;;  %p414_p8 = scmp.lt.u32.totalorder %s406_s5, %s647_s30 }
  0x58   : > { %p408_p11 = pnand %p407_p10, %p711_p12 }
  0x59   : > { %p413_p9 = por %p412_p5, %p411_p2 }
  0x5a   : > { %p409_p1 = pneg %p408_p11 }
  0x5b   : > { %p415_p0 = por %p414_p8, %p413_p9 }
  0x5d   : > { %p416_p7 = pnand %p415_p0, %p409_p1 }
  0x5f   : > { %419 = shalt.err (!%p416_p7)
}
  0x60   : > { %284 = dma.vmem_to_hbm [thread:$0]  (%p711_p12), %s649_s19, 128, %s647_s30, %s165_s9  }
  0x61 PF: > { %p295_p13 = scmp.ge.s32.totalorder %s490_s13, 2  ;;  %s192_s3 = sand.u32 1, %s462_s6  }
  0x62   : > { %p712_p4 = scmp.ne.s32.totalorder %s707_s25, 0  ;;  %s193_s15 = scalar_lea.sflag [#allocation5], %s192_s3 }
  0x64   : > { %p291_p6 = pnand %p295_p13, %p712_p4 }
  0x66   : > { %457 = dma.done.wait (!%p291_p6), %s193_s15, 128  }
  0x67   : > { %459 = vsyncadd (!%p291_p6), %s193_s15, 4294967168  ;;  %s17_s13 = sadd.s32 1, %s490_s13   ;;  %s713_s6 = smov %s466_s7 }
  0x68   : > { %p14_p3 = scmp.ge.s32.totalorder %s17_s13, 10   ;;  %s714_s7 = smov %s470_s8 }
  0x69   : > { %s715_s8 = smov %s584_s27  ;;  %s716_s9 = smov %s482_s11 }
  0x6a   : > { %s717_s10 = smov %s486_s12  ;;  %s718_s11 = smov %s721_s16 }
  0x6b   : > { %s719_s12 = smov %s725_s17  ;;  %16 = sbr.rel (!%p14_p3) target bundleno = 7 (0x7), region = 73 }
  0x72   :  { %198 = vsyncpa [#allocation4], 1 }
  0x73   :  { %200 = vsyncpa [#allocation4 + $0x1], 1 }
  0x74   :  { %201 = vsyncpa [#allocation5], 1 }
  0x75   :  { %203 = vsyncpa [#allocation5 + $0x1], 1 }

</bundles_post_ra>
